<compile_context>
chip_gen: v7x
topology: tpu7x:2x2x1
jax: 0.10.0
libtpu: 0.0.40
codegen_flags: <defaults>
</compile_context>

<pallas_src>
import jax
import jax.numpy as jnp
from jax.experimental import pallas as pl
from jax.experimental.pallas import tpu as pltpu


# ---------------------------------------------------------------------------
# helpers
# ---------------------------------------------------------------------------
def _round_up(x, m):
    return ((x + m - 1) // m) * m


def _sublane_multiple(itemsize):
    # f32 -> 8, bf16 -> 16, int8/fp8 -> 32 (sub-32-bit dtypes pack along sublanes).
    return 8 * max(1, 4 // itemsize)


def _largest_divisor_tile(padded, align, cap):
    """Largest multiple of `align` that divides `padded` and is <= cap.

    `padded` must be a positive multiple of `align`."""
    base = padded // align
    cap_units = max(1, min(base, cap // align))
    for u in range(cap_units, 0, -1):
        if base % u == 0:
            return u * align
    return align


def _descending_divisor_tiles(padded, align):
    base = padded // align
    return [u * align for u in range(base, 0, -1) if base % u == 0]


def _tpu_vmem_budget():
    """(physical VMEM bytes, per-kernel tile budget) — generation aware."""
    physical = 64 << 20  # conservative default (v7x per-TC VMEM)
    try:
        info = pltpu.get_tpu_info()
        physical = int(getattr(info, "vmem_capacity_bytes", physical))
    except Exception:
        pass
    # ~48 MiB on v7x (64 MiB physical), ~96 MiB on v5e/v6e (128 MiB physical).
    budget = min((physical * 3) // 4, 96 << 20)
    return physical, budget


# ---------------------------------------------------------------------------
# kernels
# ---------------------------------------------------------------------------
def _linear_kernel_2d(x_ref, w_ref, o_ref):
    # Full reduction in one shot: one MXU dot per (i, j) output tile.
    o_ref[...] = jnp.dot(
        x_ref[...], w_ref[...], preferred_element_type=jnp.float32
    ).astype(o_ref.dtype)


def _linear_kernel_splitk_f32(x_ref, w_ref, o_ref):
    # K is the last grid axis and the out index_map ignores it, so the output
    # tile stays resident in VMEM across K -> accumulate directly, no scratch.
    @pl.when(pl.program_id(2) == 0)
    def _():
        o_ref[...] = jnp.zeros_like(o_ref)

    o_ref[...] += jnp.dot(x_ref[...], w_ref[...], preferred_element_type=jnp.float32)


def _linear_kernel_splitk_acc(x_ref, w_ref, o_ref, acc_ref):
    @pl.when(pl.program_id(2) == 0)
    def _():
        acc_ref[...] = jnp.zeros_like(acc_ref)

    acc_ref[...] += jnp.dot(x_ref[...], w_ref[...], preferred_element_type=jnp.float32)

    @pl.when(pl.program_id(2) == pl.num_programs(2) - 1)
    def _():
        o_ref[...] = acc_ref[...].astype(o_ref.dtype)


# ---------------------------------------------------------------------------
# forward
# ---------------------------------------------------------------------------
def classifier_forward(x, params, *, tm=None, tn=None, tk=None, force_pallas=False):
    """Equivalent of PyTorch `Classifier.forward` (nn.Linear(dim, class_num, bias=False)).

    x:      [..., dim]
    params: dict from init_classifier_params; params["w"] is the weight stored
            pre-transposed and pre-padded to [d_pad, c_pad] (== round_up to 128).
    Returns [..., class_num] in x.dtype.
    """
    w_p = params["w"]
    dim = params["dim"]
    class_num = params["class_num"]
    d_pad, c_pad = w_p.shape

    *lead, xd = x.shape
    assert xd == dim, f"expected last dim {dim}, got {xd}"

    m = 1
    for s in lead:
        m *= s

    out_dtype = x.dtype
    compute_dtype = w_p.dtype
    in_item = jnp.dtype(compute_dtype).itemsize
    out_item = jnp.dtype(out_dtype).itemsize

    # ---- small-shape fast path: launch + padding copies would dominate ----
    if not force_pallas and 2 * m * dim * class_num < (1 << 22):
        y = jnp.einsum(
            "...d,dc->...c", x.astype(compute_dtype), w_p[:dim, :class_num]
        )
        return y.astype(out_dtype)

    # ---- pad activations only to the hardware minimum (sublane / lane) ----
    sub = max(_sublane_multiple(in_item), _sublane_multiple(out_item))
    m_pad = _round_up(max(m, 1), sub)

    x2d = x.reshape(m, dim).astype(compute_dtype)
    if (m_pad, d_pad) != (m, dim):
        x2d = jnp.pad(x2d, ((0, m_pad - m), (0, d_pad - dim)))

    # ---- tile selection (divisors of the padded dims, within the VMEM budget) ----
    physical, budget = _tpu_vmem_budget()
    auto_mn = tm is None and tn is None

    if tm is None:
        tm = _largest_divisor_tile(m_pad, sub, 512)
    if tn is None:
        # 512 target keeps tn a multiple of 256 whenever c_pad allows it (v6e/v7x MXU).
        tn = _largest_divisor_tile(c_pad, 128, 512)

    def _footprint(tm_, tn_, tk_, needs_acc):
        fp = 2 * (tm_ * tk_ + tk_ * tn_) * in_item + 2 * tm_ * tn_ * out_item
        if needs_acc:
            fp += tm_ * tn_ * 4
        return fp

    if tk is None:
        if _footprint(tm, tn, d_pad, False) <= budget:
            tk = d_pad  # collapse the whole reduction -> 2-D grid
        else:
            tk = 128
            for cand in _descending_divisor_tiles(d_pad, 128):
                if cand < d_pad and _footprint(tm, tn, cand, True) <= budget:
                    tk = cand
                    break

    split_k = tk < d_pad

    # v7x megacore: make sure at least one "parallel" axis has >= 2 tiles.
    if auto_mn and (m_pad // tm) * (c_pad // tn) == 1:
        if c_pad >= 256:
            tn = _largest_divisor_tile(c_pad, 128, c_pad // 2)
        elif m_pad >= 2 * sub:
            tm = _largest_divisor_tile(m_pad, sub, m_pad // 2)

    grid_m = m_pad // tm
    grid_n = c_pad // tn

    needs_acc = split_k and jnp.dtype(out_dtype) != jnp.float32
    footprint = _footprint(tm, tn, tk, needs_acc)
    # Generation-aware limit; never below what the chosen tiles actually need.
    vmem_limit = int(min(max(footprint + (2 << 20), 16 << 20), budget))
    vmem_limit = max(vmem_limit, footprint + (1 << 20))

    cost = pl.CostEstimate(
        flops=2 * m * dim * class_num,
        bytes_accessed=(m * dim * in_item
                        + dim * class_num * in_item
                        + m * class_num * out_item),
        transcendentals=0,
    )

    if not split_k:
        grid = (grid_m, grid_n)
        kernel = _linear_kernel_2d
        in_specs = [
            pl.BlockSpec((tm, tk), lambda i, j: (i, 0)),
            pl.BlockSpec((tk, tn), lambda i, j: (0, j)),
        ]
        out_spec = pl.BlockSpec((tm, tn), lambda i, j: (i, j))
        scratch = []
        dims = ("parallel", "parallel")
    else:
        grid = (grid_m, grid_n, d_pad // tk)
        in_specs = [
            pl.BlockSpec((tm, tk), lambda i, j, k: (i, k)),
            pl.BlockSpec((tk, tn), lambda i, j, k: (k, j)),
        ]
        out_spec = pl.BlockSpec((tm, tn), lambda i, j, k: (i, j))
        dims = ("parallel", "parallel", "arbitrary")
        if not needs_acc:
            kernel = _linear_kernel_splitk_f32
            scratch = []
        else:
            kernel = _linear_kernel_splitk_acc
            scratch = [pltpu.VMEM((tm, tn), jnp.float32)]

    out = pl.pallas_call(
        kernel,
        out_shape=jax.ShapeDtypeStruct((m_pad, c_pad), out_dtype),
        grid_spec=pltpu.PrefetchScalarGridSpec(
            num_scalar_prefetch=0,
            grid=grid,
            in_specs=in_specs,
            out_specs=out_spec,
            scratch_shapes=scratch,
        ),
        compiler_params=pltpu.CompilerParams(
            dimension_semantics=dims,
            vmem_limit_bytes=int(vmem_limit),
        ),
        cost_estimate=cost,
    )(x2d, w_p)

    out = out[:m, :class_num]
    return out.reshape(*lead, class_num)


def init_classifier_params(key, dim, class_num, dtype=jnp.float32):
    """weights_init_classifier: normal_(std=0.001), no bias.

    The weight is stored pre-transposed ([dim, class_num]) AND pre-padded to the
    lane-aligned shape [round_up(dim,128), round_up(class_num,128)] once here, so
    the forward pass never re-pads or transposes the weight in HBM.  Pass
    dtype=jnp.bfloat16 to enable the low-precision MXU path on v6e/v7x.
    """
    w = 0.001 * jax.random.normal(key, (class_num, dim), dtype=jnp.float32)  # torch layout
    w_t = jnp.asarray(w.T).astype(dtype)                                     # [dim, class_num]
    d_pad = _round_up(dim, 128)
    c_pad = _round_up(class_num, 128)
    if (d_pad, c_pad) != (dim, class_num):
        w_t = jnp.pad(w_t, ((0, d_pad - dim), (0, c_pad - class_num)))
    return {"w": w_t, "dim": dim, "class_num": class_num}


if __name__ == "__main__":
    key = jax.random.PRNGKey(0)
    k_w, k_x = jax.random.split(key)

    dim = 32         # hidden dim of the DETR decoder features
    class_num = 16   # number of classes
    batch, seq = 2, 8

    params = init_classifier_params(k_w, dim, class_num)                 # padded [128,128]
    x = jax.random.normal(k_x, (batch, seq, dim), dtype=jnp.float32)

    # force_pallas=True so the demo exercises the Pallas kernel (the small-shape
    # fast path would otherwise dispatch to jnp.einsum).
    y = classifier_forward(x, params, force_pallas=True)
    y = jax.block_until_ready(y)

    # Reference check against plain JAX (x @ W^T) using the unpadded weight.
    w_true = params["w"][:dim, :class_num]
    y_ref = jnp.einsum("bsd,dc->bsc", x, w_true)

    assert y.shape == (batch, seq, class_num)
    assert jnp.allclose(y, y_ref, atol=1e-5, rtol=1e-5)

    print("KERNEL_OK")
</pallas_src>

<mosaic_0001>
module attributes {stable_mosaic.version = 11 : i64} {
  func.func @_linear_kernel_2d(%arg0: i32, %arg1: i32, %arg2: memref<8x128xf32, #tpu.memory_space<vmem>>, %arg3: memref<128x128xf32, #tpu.memory_space<vmem>>, %arg4: memref<8x128xf32, #tpu.memory_space<vmem>>) attributes {dimension_semantics = [#tpu.dimension_semantics<parallel>, #tpu.dimension_semantics<parallel>], iteration_bounds = array<i64: 2, 1>, scalar_prefetch = 0 : i64, scratch_operands = 0 : i64, tpu.core_type = #tpu.core_type<tc>, window_params = [{transform_indices = @transform_0, window_bounds = array<i64: 8, 128>}, {transform_indices = @transform_1, window_bounds = array<i64: 128, 128>}, {transform_indices = @transform_2, window_bounds = array<i64: 8, 128>}]} {
    %c0 = arith.constant 0 : index
    %c0_0 = arith.constant 0 : index
    %0 = vector.load %arg2[%c0, %c0_0] : memref<8x128xf32, #tpu.memory_space<vmem>>, vector<8x128xf32>
    %c0_1 = arith.constant 0 : index
    %c0_2 = arith.constant 0 : index
    %1 = vector.load %arg3[%c0_1, %c0_2] : memref<128x128xf32, #tpu.memory_space<vmem>>, vector<128x128xf32>
    %cst = arith.constant dense<0.000000e+00> : vector<8x128xf32>
    %2 = tpu.matmul %0, %1, %cst {dimension_numbers = #tpu.dot_dimension_numbers<[1], [0], [0], [1], [0, 0, 1, 1], [], []>} : vector<8x128xf32>, vector<128x128xf32>, vector<8x128xf32> -> vector<8x128xf32>
    %c0_3 = arith.constant 0 : index
    %c0_4 = arith.constant 0 : index
    %3 = vector.load %arg4[%c0_3, %c0_4] : memref<8x128xf32, #tpu.memory_space<vmem>>, vector<8x128xf32>
    tpu.vector_store %arg4[%c0_3, %c0_4], %2 {strides = array<i32>} : memref<8x128xf32, #tpu.memory_space<vmem>>, vector<8x128xf32>,
    return
  }
  func.func @transform_0(%arg0: i32, %arg1: i32) -> (i32, i32) {
    %c0_i32 = arith.constant 0 : i32
    %c0_i32_0 = arith.constant 0 : i32
    return %arg0, %c0_i32 : i32, i32
  }
  func.func @transform_1(%arg0: i32, %arg1: i32) -> (i32, i32) {
    %c0_i32 = arith.constant 0 : i32
    %c0_i32_0 = arith.constant 0 : i32
    return %c0_i32, %arg1 : i32, i32
  }
  func.func @transform_2(%arg0: i32, %arg1: i32) -> (i32, i32) {
    %c0_i32 = arith.constant 0 : i32
    return %arg0, %arg1 : i32, i32
  }
}

</mosaic_0001>

<bundles_post_ra>
// kernel: tpu_custom_call.1
= control target key start
LH: loop header
LB: loop body
LE: loop exit
PB: predicated region body
PF: predicated region fallthrough
CT: control target
= control target key end

     0   :  { %7 = vsyncpa [#allocation3], 0  ;;  %s948_s0 = inlined_call_operand.hbm [shape: f32[16,128], index: 0, kind: input, shape index: {}]   ;;  %s949_s1 = inlined_call_operand.hbm [shape: f32[128,128], index: 1, kind: input, shape index: {}]   ;;  %s950_s2 = inlined_call_operand.hbm [shape: f32[16,128], index: 2, kind: output, shape index: {}]  }
   0x1   :  { %9 = vsyncpa [#allocation3 + $0x1], 0 }
   0x2   :  { %10 = vsyncpa [#allocation6], 0 }
   0x3   :  { %11 = vsyncpa [#allocation4], 0 }
   0x4   :  { %13 = vsyncpa [#allocation4 + $0x1], 0  ;;  %s727_s9 = smov 0   ;;  %s729_s10 = smov 0  }
   0x5   :  { %s731_s11 = smov 0   ;;  %s733_s12 = smov 0  }
   0x6   :  { %s735_s13 = smov 0   ;;  %s737_s14 = smov 0  }
   0x7 LB: > { %s389_s15 = sadd.s32 4294967295, %s702_s14   ;;  %s390_s16 = sadd.s32 4294967294, %s702_s14   ;;  %s702_s14 = sphi %s737_s14, %s19_s14   ;;  %s698_s13 = sphi %s735_s13, %s974_s13   ;;  %s694_s12 = sphi %s733_s12, %s973_s12   ;;  %s690_s11 = sphi %s731_s11, %s972_s11   ;;  %s686_s10 = sphi %s729_s10, %s971_s10   ;;  %s682_s9 = sphi %s727_s9, %s970_s9  }
   0x8   : > { %p51_p0 = scmp.ne.s32.totalorder %s686_s10, %s682_s9  ;;  %p761_p1 = scmp.eq.s32.totalorder %s389_s15, 0 }
   0x9   : > { %p765_p2 = scmp.eq.s32.totalorder %s389_s15, 1  ;;  %p109_p3 = scmp.eq.s32.totalorder %s390_s16, 1 }
   0xa   : > { %s955_s17 = scalar_select %p761_p1, 1, 0 }
   0xb   : > { %s956_s18 = scalar_select %p765_p2, 1, 0 }
   0xc   : > { %p771_p4 = por %p761_p1, %p51_p0  ;;  %p391_p5 = scmp.ge.s32.totalorder %s702_s14, 1 }
   0xd   : > { %p776_p6 = por %p109_p3, %p51_p0  ;;  %p116_p7 = scmp.lt.s32.totalorder %s702_s14, 3 }
   0xe   : > { %s957_s19 = scalar_select %p771_p4, 1, 0 }
   0xf   : > { %s958_s20 = scalar_select %p776_p6, 1, 0 }
  0x10   : > { %p781_p8 = pnand %p391_p5, %p116_p7  ;;  %s704_s22 = smov [#allocation5]  }
  0x11   : > { %s130_s23 = sshll.u32 %s704_s22, 4  ;;  %s31_s25 = sadd.s32 1, %s698_s13  ;;  %s131_s23 = int_to_ptr.vmem [resolvable:$true] %s130_s23 }
  0x12   : > { %s959_s21 = scalar_select %p781_p8, 1, 0 }
  0x13   : > { %p488_p9 = pneg %p781_p8  ;;  %s558_s28 = scalar_lea.hbm %s949_s1, 2048 }
  0x14   : > { %p559_p12 = scmp.ne.s32.totalorder %s949_s1, %s558_s28  ;;  %p565_p5 = scmp.lt.u32.totalorder %s558_s28, %s949_s1 }
  0x15   : > { %p790_p11 = pnand %p488_p9, %p761_p1 }
  0x17   : > { %p560_p13 = pneg %p790_p11 }
  0x19   : > { %p561_p0 = pnand %p560_p13, %p559_p12 }
  0x1b   : > { %p562_p3 = pneg %p561_p0 }
  0x1d   : > { %p567_p7 = pnand %p565_p5, %p562_p3 }
  0x1f   : > { %570 = shalt.err (!%p567_p7)
}
  0x20   : > { %s571_s5 = scalar_lea.vmem %s131_s23, 2048  ;;  %p579_p1 = scmp.lt.s32.totalorder %s131_s23, %s131_s23 }
  0x21   : > { %p572_p9 = scmp.ne.s32.totalorder %s131_s23, %s571_s5  ;;  %p580_p4 = scmp.lt.s32.totalorder %s571_s5, %s571_s5 }
  0x23   : > { %p574_p10 = pnand %p572_p9, %p560_p13  ;;  %p581_p8 = por %p580_p4, %p579_p1 }
  0x25   : > { %p575_p6 = pneg %p574_p10 }
  0x27   : > { %p582_p2 = pnand %p581_p8, %p575_p6 }
  0x29   : > { %585 = shalt.err (!%p582_p2)
}
  0x2a   : > { %s705_s6 = smov 128   ;;  %s706_s7 = smov 8  }
  0x2b   : > { %491 = dma.hbm_to_vmem [thread:$0]  (!%p790_p11), %s949_s1, 2048, %s131_s23, [#allocation6], %s705_s6, %s705_s6, %s706_s7  }
  0x2c   : > { %p33_p1 = scmp.ge.s32.totalorder %s31_s25, 2  ;;  %s38_s16 = sadd.s32 1, %s690_s11 }
  0x2d   : > { %p45_p2 = scmp.ne.s32.totalorder %s690_s11, %s686_s10  ;;  %p46_p4 = scmp.eq.s32.totalorder %s702_s14, 0 }
  0x2e   : > { %s976_s25 = smov (%p33_p1, %s31_s25), 0  ;;  %p962_p8 = scmp.ne.s32.totalorder %s956_s18, 0 }
  0x2f   : > { %p817_p6 = por %p46_p4, %p45_p2  ;;  %s35_s24 = ssub.s32 %s698_s13, %s976_s25 }
  0x30   : > { %p823_p10 = por %p962_p8, %p45_p2  ;;  %p501_p12 = scmp.lt.s32.totalorder %s702_s14, 2 }
  0x31   : > { %p36_p11 = scmp.eq.s32.totalorder %s35_s24, 0  ;;  %s144_s23 = sand.u32 1, %s690_s11  }
  0x32   : > { %s394_s27 = sshll.u32 %s144_s23, 3  ;;  %s395_s29 = sshll.u32 %s698_s13, 7 }
  0x33   : > { %s832_s28 = scalar_select %p36_p11, %s690_s11, %s38_s16  }
  0x34   : > { %s838_s4 = scalar_lea.hbm %s948_s0, %s395_s29  ;;  %s148_s18 = scalar_lea.vmem [#allocation2], %s394_s27 }
  0x35   : > { %s155_s5 = sshll.u32 %s148_s18, 4  ;;  %p844_p13 = pnand %p501_p12, %p817_p6  ;;  %s840_s5 = int_to_ptr.vmem [resolvable:$true] %s155_s5 }
  0x36   : > { %s145_s7 = scalar_lea.sflag [#allocation3], %s144_s23  ;;  %s586_s8 = scalar_lea.hbm %s838_s4, 128 }
  0x37   : > { %p587_p0 = scmp.ne.s32.totalorder %s838_s4, %s586_s8  ;;  %p588_p3 = pneg %p844_p13 }
  0x38   : > { %s591_s24 = scalar_lea.hbm %s948_s0, 256  ;;  %p592_p9 = scmp.lt.u32.totalorder %s838_s4, %s948_s0 }
  0x39   : > { %p589_p5 = pnand %p588_p3, %p587_p0  ;;  %p593_p1 = scmp.lt.u32.totalorder %s591_s24, %s586_s8 }
  0x3a   : > { %p595_p4 = scmp.lt.u32.totalorder %s586_s8, %s838_s4 }
  0x3b   : > { %p590_p7 = pneg %p589_p5  ;;  %p594_p2 = por %p593_p1, %p592_p9 }
  0x3d   : > { %p596_p6 = por %p595_p4, %p594_p2 }
  0x3f   : > { %p597_p8 = pnand %p596_p6, %p590_p7 }
  0x41   : > { %600 = shalt.err (!%p597_p8)
}
  0x42   : > { %s601_s23 = scalar_lea.vmem %s840_s5, 128  ;;  %s707_s29 = smov [#allocation2]  }
  0x43   : > { %p602_p12 = scmp.ne.s32.totalorder %s840_s5, %s601_s23  ;;  %s606_s30 = sshll.u32 %s707_s29, 4  ;;  %s607_s30 = int_to_ptr.vmem [resolvable:$false] %s606_s30 }
  0x44   : > { %s608_s3 = scalar_lea.vmem %s607_s30, 256  ;;  %p609_p5 = scmp.lt.s32.totalorder %s840_s5, %s607_s30 }
  0x45   : > { %p604_p11 = pnand %p602_p12, %p588_p3  ;;  %p610_p9 = scmp.lt.s32.totalorder %s608_s3, %s601_s23 }
  0x47   : > { %p605_p0 = pneg %p604_p11  ;;  %p611_p1 = por %p610_p9, %p609_p5 }
  0x49   : > { %p612_p2 = pnand %p611_p1, %p605_p0 }
  0x4b   : > { %615 = shalt.err (!%p612_p2)
}
  0x4c   : > { %495 = dma.hbm_to_vmem [thread:$0]  (!%p844_p13), %s838_s4, 128, %s840_s5, %s145_s7  }
  0x4d   : > { %p965_p7 = scmp.ne.s32.totalorder %s959_s21, 0 }
  0x4e   : > { %s876_s18 = sand.u32 (!%p965_p7), 1, %s686_s10   ;;  %p966_p3 = scmp.ne.s32.totalorder (!%p965_p7), %s957_s19, 0 }
  0x4f   : > { %164 = sbr.rel (%p965_p7) target bundleno = 351 (0x15f), region = 28  ;;  %s397_s8 = sshll.u32 (!%p965_p7), %s876_s18, 3 }
  0x50   : > { %s167_s15 = scalar_lea.sflag (!%p965_p7), [#allocation3], %s876_s18  ;;  %s882_s16 = scalar_lea.vmem (!%p965_p7), [#allocation2], %s397_s8 }
  0x56   : > { %669 = dma.done.wait (%p966_p3), %s167_s15, 128  }
  0x57   : > { %671 = vsyncadd (%p966_p3), %s167_s15, 4294967168  ;;  %p967_p13 = scmp.ne.s32.totalorder %s955_s17, 0 }
  0x59   : > { %673 = dma.done.wait (%p967_p13), [#allocation6], 2048  }
  0x5a   : > { %675 = vsyncadd (%p967_p13), [#allocation6], 4294965248  ;;  %v708_v0 = vmov 0.0|0.0   ;;  %vm709_vm0 = vmmov 0   ;;  %v710_v1 = vmov 0.0   ;;  %v196_v2 = vld [vmem:[#allocation5] sm:$0xff] }
  0x5b   : > { %456 = vmatprep.subr.bf16.mxu0 %v708_v0  ;;  %453 = vmatprep.mubr.msk.f32.mxu0 %vm709_vm0, %v710_v1  ;;  %v197_v3 = vld [vmem:[#allocation5 + $0x8] sm:$0xff]  ;;  %v198_v4 = vld [vmem:[#allocation5 + $0x10] sm:$0xff]  ;;  %v199_v6 = vld [vmem:[#allocation5 + $0x18] sm:$0xff]  ;;  %s194_s17 = scalar_lea.vmem [#allocation7], %s397_s8  ;;  %s401_s21 = sshll.u32 %s694_s12, 7 }
  0x5c   : > { %v457_v5 = vpack.c.bf16 %v197_v3, %v196_v2  ;;  %v460_v7 = vpack.c.bf16 %v199_v6, %v198_v4  ;;  %v200_v8 = vld [vmem:[#allocation5 + $0x20] sm:$0xff]  ;;  %v201_v9 = vld [vmem:[#allocation5 + $0x28] sm:$0xff]  ;;  %v202_v11 = vld [vmem:[#allocation5 + $0x30] sm:$0xff]  ;;  %s298_s19 = sshll.u32 %s194_s17, 4  ;;  %s901_s6 = scalar_lea.hbm %s950_s2, %s401_s21  ;;  %s896_s19 = int_to_ptr.vmem [resolvable:$true] %s298_s19 }
  0x5d   : > { %v463_v10 = vpack.c.bf16 %v201_v9, %v200_v8  ;;  %v203_v12 = vld [vmem:[#allocation5 + $0x38] sm:$0xff]  ;;  %v204_v14 = vld [vmem:[#allocation5 + $0x40] sm:$0xff]  ;;  %v205_v15 = vld [vmem:[#allocation5 + $0x48] sm:$0xff]  ;;  %s284_s7 = scalar_lea.sflag [#allocation4], %s876_s18  ;;  %s616_s24 = scalar_lea.vmem %s896_s19, 128 }
  0x5e   : > { %458 = vmatpush3.bf16.msra.mxu0 %v457_v5  ;;  %v466_v13 = vpack.c.bf16 %v203_v12, %v202_v11  ;;  %v469_v16 = vpack.c.bf16 %v205_v15, %v204_v14  ;;  %v206_v17 = vld [vmem:[#allocation5 + $0x50] sm:$0xff]  ;;  %v207_v18 = vld [vmem:[#allocation5 + $0x58] sm:$0xff]  ;;  %v208_v20 = vld [vmem:[#allocation5 + $0x60] sm:$0xff]  ;;  %p617_p4 = scmp.ne.s32.totalorder %s896_s19, %s616_s24  ;;  %s711_s12 = smov [#allocation7]  }
  0x5f   : > { %459 = vmatprep.subr.bf16.mxu0 %v708_v0  ;;  %v472_v19 = vpack.c.bf16 %v207_v18, %v206_v17  ;;  %v209_v21 = vld [vmem:[#allocation5 + $0x68] sm:$0xff]  ;;  %v210_v23 = vld [vmem:[#allocation5 + $0x70] sm:$0xff]  ;;  %v211_v24 = vld [vmem:[#allocation5 + $0x78] sm:$0xff]  ;;  %s620_s22 = sshll.u32 %s711_s12, 4  ;;  %s621_s22 = int_to_ptr.vmem [resolvable:$false] %s620_s22 }
  0x60   : > { %v475_v22 = vpack.c.bf16 %v209_v21, %v208_v20  ;;  %v478_v25 = vpack.c.bf16 %v211_v24, %v210_v23  ;;  %v195_v26 = vld [vmem:[%s882_s16] sm:$0xff]  ;;  %p618_p6 = pnand %p617_p4, %p823_p10  ;;  %s622_s27 = scalar_lea.vmem %s621_s22, 256 }
  0x61   : > { %p623_p12 = scmp.lt.s32.totalorder %s896_s19, %s621_s22  ;;  %p624_p11 = scmp.lt.s32.totalorder %s622_s27, %s616_s24 }
  0x62   : > { %461 = vmatpush3.bf16.msra.mxu0 %v460_v7  ;;  %p619_p8 = pneg %p618_p6 }
  0x63   : > { %462 = vmatprep.subr.bf16.mxu0 %v708_v0  ;;  %p625_p0 = por %p624_p11, %p623_p12 }
  0x65   : > { %p626_p5 = pnand %p625_p0, %p619_p8 }
  0x66   : > { %464 = vmatpush3.bf16.msra.mxu0 %v463_v10 }
  0x67   : > { %465 = vmatprep.subr.bf16.mxu0 %v708_v0 }
  0x6a   : > { %467 = vmatpush3.bf16.msra.mxu0 %v466_v13 }
  0x6b   : > { %468 = vmatprep.subr.bf16.mxu0 %v708_v0 }
  0x6e   : > { %470 = vmatpush3.bf16.msra.mxu0 %v469_v16 }
  0x6f   : > { %471 = vmatprep.subr.bf16.mxu0 %v708_v0 }
  0x72   : > { %473 = vmatpush3.bf16.msra.mxu0 %v472_v19 }
  0x73   : > { %474 = vmatprep.subr.bf16.mxu0 %v708_v0 }
  0x76   : > { %476 = vmatpush3.bf16.msra.mxu0 %v475_v22 }
  0x77   : > { %477 = vmatprep.subr.bf16.mxu0 %v708_v0 }
  0x7a   : > { %479 = vmatpush3.bf16.msra.mxu0 %v478_v25 }
  0x7d   : > { %454 = vmatmul.mubr.f32.vlgmr.msra.gmra.mrb[0].mxu0 %v195_v26 }
 0x150   : > { %v278_v27 = vpop.f32.mrb[0].mxu0 }
 0x151   : > { %282 = vst [vmem:[%s194_s17] sm:$0xff] %v278_v27  ;;  %v455_v28 = vpop.f32.mrb[1].mxu0 }
 0x152   : > { %629 = shalt.err (!%p626_p5)
}
 0x153   : > { %s630_s23 = scalar_lea.hbm %s901_s6, 128  ;;  %s634_s3 = scalar_lea.hbm %s950_s2, 256 }
 0x154   : > { %p631_p9 = scmp.ne.s32.totalorder %s901_s6, %s630_s23  ;;  %p635_p7 = scmp.lt.u32.totalorder %s901_s6, %s950_s2 }
 0x155   : > { %p636_p3 = scmp.lt.u32.totalorder %s634_s3, %s630_s23  ;;  %p638_p4 = scmp.lt.u32.totalorder %s630_s23, %s901_s6 }
 0x156   : > { %p632_p1 = pnand %p631_p9, %p823_p10 }
 0x157   : > { %p637_p13 = por %p636_p3, %p635_p7 }
 0x158   : > { %p633_p2 = pneg %p632_p1 }
 0x159   : > { %p639_p6 = por %p638_p4, %p637_p13 }
 0x15b   : > { %p640_p8 = pnand %p639_p6, %p633_p2 }
 0x15d   : > { %643 = shalt.err (!%p640_p8)
}
 0x15e   : > { %486 = dma.vmem_to_hbm [thread:$0]  (%p823_p10), %s896_s19, 128, %s901_s6, %s284_s7  }
 0x15f PF: > { %s310_s15 = sand.u32 1, %s682_s9   ;;  %p968_p12 = scmp.ne.s32.totalorder %s958_s20, 0 }
 0x160   : > { %p969_p11 = scmp.ge.s32.totalorder %s702_s14, 2  ;;  %s311_s16 = scalar_lea.sflag [#allocation4], %s310_s15 }
 0x162   : > { %p497_p0 = pnand %p969_p11, %p968_p12 }
 0x164   : > { %677 = dma.done.wait (!%p497_p0), %s311_s16, 128  }
 0x165   : > { %679 = vsyncadd (!%p497_p0), %s311_s16, 4294967168  ;;  %s19_s14 = sadd.s32 1, %s702_s14   ;;  %s970_s9 = smov %s686_s10 }
 0x166   : > { %p16_p5 = scmp.ge.s32.totalorder %s19_s14, 4   ;;  %s971_s10 = smov %s690_s11 }
 0x167   : > { %s972_s11 = smov %s832_s28  ;;  %s973_s12 = smov %s698_s13 }
 0x168   : > { %s974_s13 = smov %s976_s25  ;;  %18 = sbr.rel (!%p16_p5) target bundleno = 7 (0x7), region = 78 }
 0x16f   :  { %316 = vsyncpa [#allocation3], 1 }
 0x170   :  { %318 = vsyncpa [#allocation3 + $0x1], 1 }
 0x171   :  { %319 = vsyncpa [#allocation6], 1 }
 0x172   :  { %320 = vsyncpa [#allocation4], 1 }
 0x173   :  { %322 = vsyncpa [#allocation4 + $0x1], 1 }

</bundles_post_ra>
